<compile_context>
chip_gen: v6e
topology: v6e:2x2x1
jax: 0.10.0
libtpu: 0.0.40
codegen_flags: <defaults>
</compile_context>

<pallas_src>
import jax
import jax.numpy as jnp
from jax.experimental import pallas as pl
from jax.experimental.pallas import tpu as pltpu

IN_FEATURES = 2500   # nn.Linear(2500, 50)
H1 = 50
H2 = 20
OUT = 2

# Packed-slab layout for the tiny fc2/fc3 weights (one DMA instead of two).
# W2 ([50, 20], in-major) lives at rows 0:50, cols 0:20.
# W3 ([20, 2],  in-major) lives at rows 64:84, cols 0:2 (16-aligned start for
# clean bf16 sublane packing).
W23_SHAPE = (96, 128)
W3_ROW0 = 64
BIAS_SHAPE = (1, 128)    # [b1 (50) | b2 (20) | b3 (2) | zeros] along lanes


def mlp_kernel(x_ref, w1_ref, w23_ref, b_ref, o_ref):
    # Cast activations to bf16 in-kernel (VPU op, hidden under the W1 DMA).
    x = x_ref[...].astype(jnp.bfloat16)            # [B, 2500]
    w1 = w1_ref[...]                               # [50, 2500] bf16, lane-dense
    w23 = w23_ref[...]                             # [96, 128]  bf16 slab
    b = b_ref[...]                                 # [1, 128]   f32

    w2 = w23[0:H1, 0:H2]                           # [50, 20]
    w3 = w23[W3_ROW0:W3_ROW0 + H2, 0:OUT]          # [20, 2]
    b1 = b[:, 0:H1]
    b2 = b[:, H1:H1 + H2]
    b3 = b[:, H1 + H2:H1 + H2 + OUT]

    # fc1: x @ W1^T  ("nt" contraction over the last dims), f32 MXU accumulation.
    h1 = jax.lax.dot_general(
        x, w1, (((1,), (1,)), ((), ())),
        preferred_element_type=jnp.float32) + b1                    # [B, 50] f32
    # fc2 (+ tanh in f32 on the EUP)
    h2 = jnp.dot(h1.astype(jnp.bfloat16), w2,
                 preferred_element_type=jnp.float32) + b2           # [B, 20] f32
    h2 = jnp.tanh(h2)
    # fc3
    o = jnp.dot(h2.astype(jnp.bfloat16), w3,
                preferred_element_type=jnp.float32) + b3            # [B, 2] f32
    o_ref[...] = o


def net_forward(x, kernel_params):
    """x: [B, 2500] f32. kernel_params = (w1 [50,2500] bf16, w23 slab, bias pack)."""
    w1, w23, b = kernel_params
    B = x.shape[0]

    operands = (x, w1, w23, b)
    bytes_accessed = (
        sum(int(o.size) * o.dtype.itemsize for o in operands) + B * OUT * 4
    )
    cost = pl.CostEstimate(
        flops=2 * B * (IN_FEATURES * H1 + H1 * H2 + H2 * OUT),
        transcendentals=B * H2,
        bytes_accessed=bytes_accessed,
    )

    vmem = pl.BlockSpec(memory_space=pltpu.MemorySpace.VMEM)
    return pl.pallas_call(
        mlp_kernel,
        out_shape=jax.ShapeDtypeStruct((B, OUT), jnp.float32),
        in_specs=[vmem] * 4,
        out_specs=vmem,
        cost_estimate=cost,
    )(*operands)


def init_params(key):
    """PyTorch nn.Linear default init: U(-1/sqrt(fan_in), +1/sqrt(fan_in)).

    Returns:
      kernel_params: (w1 [50,2500] bf16, w23 slab [96,128] bf16, bias [1,128] f32)
      ref_params:    f32 PyTorch-layout params for the fidelity reference.
    """
    def linear(k, fan_in, fan_out):
        kw, kb = jax.random.split(k)
        bound = 1.0 / jnp.sqrt(float(fan_in))
        w = jax.random.uniform(kw, (fan_out, fan_in), jnp.float32, -bound, bound)
        b = jax.random.uniform(kb, (fan_out,), jnp.float32, -bound, bound)
        return w, b

    k1, k2, k3 = jax.random.split(key, 3)
    w1_f32, b1_f32 = linear(k1, IN_FEATURES, H1)   # [50, 2500], [50]
    w2_f32, b2_f32 = linear(k2, H1, H2)            # [20, 50],   [20]
    w3_f32, b3_f32 = linear(k3, H2, OUT)           # [2, 20],    [2]

    # Kernel-side packing.
    w1 = w1_f32.astype(jnp.bfloat16)                                 # lane-dense [50, 2500]
    w23 = jnp.zeros(W23_SHAPE, jnp.bfloat16)
    w23 = w23.at[0:H1, 0:H2].set(w2_f32.T.astype(jnp.bfloat16))      # W2 as [in, out]
    w23 = w23.at[W3_ROW0:W3_ROW0 + H2, 0:OUT].set(w3_f32.T.astype(jnp.bfloat16))
    bias = jnp.zeros(BIAS_SHAPE, jnp.float32)
    bias = bias.at[0, 0:H1].set(b1_f32)
    bias = bias.at[0, H1:H1 + H2].set(b2_f32)
    bias = bias.at[0, H1 + H2:H1 + H2 + OUT].set(b3_f32)

    kernel_params = (w1, w23, bias)
    ref_params = (w1_f32, b1_f32, w2_f32, b2_f32, w3_f32, b3_f32)
    return kernel_params, ref_params


def reference_forward_f32(x, ref_params):
    """Pure-f32 pure-JAX reference matching the PyTorch Net exactly."""
    w1, b1, w2, b2, w3, b3 = ref_params
    h1 = x @ w1.T + b1
    h2 = jnp.tanh(h1 @ w2.T + b2)
    return h2 @ w3.T + b3


def reference_forward_matched(x, ref_params):
    """Pure-JAX reference matching the kernel's numerics (bf16 operands,
    f32 accumulation, f32 biases)."""
    w1, b1, w2, b2, w3, b3 = ref_params
    xb = x.astype(jnp.bfloat16)
    h1 = jnp.dot(xb, w1.T.astype(jnp.bfloat16),
                 preferred_element_type=jnp.float32) + b1
    h2 = jnp.tanh(
        jnp.dot(h1.astype(jnp.bfloat16), w2.T.astype(jnp.bfloat16),
                preferred_element_type=jnp.float32) + b2)
    return (jnp.dot(h2.astype(jnp.bfloat16), w3.T.astype(jnp.bfloat16),
                    preferred_element_type=jnp.float32) + b3)


if __name__ == "__main__":
    key = jax.random.PRNGKey(0)
    kx, kp = jax.random.split(key)

    B = 8  # small batch; feature dim fixed at 2500 by the module
    x = jax.random.normal(kx, (B, IN_FEATURES), jnp.float32)
    kernel_params, ref_params = init_params(kp)

    out = net_forward(x, kernel_params)
    out = jax.block_until_ready(out)
    assert out.shape == (B, OUT), out.shape

    # Self-consistency vs a reference with identical bf16/f32 numerics (tight).
    ref_matched = reference_forward_matched(x, ref_params)
    assert jnp.allclose(out, ref_matched, atol=5e-3, rtol=5e-3), (
        "mismatch vs bf16-matched reference")

    # Fidelity vs the original f32 PyTorch semantics (bf16 drift tolerance).
    ref_f32 = reference_forward_f32(x, ref_params)
    assert jnp.allclose(out, ref_f32, atol=3e-2, rtol=3e-2), (
        "mismatch vs f32 PyTorch-semantics reference")

    print("KERNEL_OK")
</pallas_src>

<mosaic_0001>
module attributes {stable_mosaic.version = 11 : i64} {
  func.func @mlp_kernel(%arg0: memref<8x2500xf32, #tpu.memory_space<vmem>>, %arg1: memref<50x2500xbf16, #tpu.memory_space<vmem>>, %arg2: memref<96x128xbf16, #tpu.memory_space<vmem>>, %arg3: memref<1x128xf32, #tpu.memory_space<vmem>>, %arg4: memref<8x2xf32, #tpu.memory_space<vmem>>) attributes {dimension_semantics = [], scalar_prefetch = 0 : i64, scratch_operands = 0 : i64, tpu.core_type = #tpu.core_type<tc>} {
    %c0 = arith.constant 0 : index
    %c0_0 = arith.constant 0 : index
    %0 = vector.load %arg0[%c0, %c0_0] : memref<8x2500xf32, #tpu.memory_space<vmem>>, vector<8x2500xf32>
    %1 = arith.truncf %0 : vector<8x2500xf32> to vector<8x2500xbf16>
    %c0_1 = arith.constant 0 : index
    %c0_2 = arith.constant 0 : index
    %2 = vector.load %arg1[%c0_1, %c0_2] : memref<50x2500xbf16, #tpu.memory_space<vmem>>, vector<50x2500xbf16>
    %c0_3 = arith.constant 0 : index
    %c0_4 = arith.constant 0 : index
    %3 = vector.load %arg2[%c0_3, %c0_4] : memref<96x128xbf16, #tpu.memory_space<vmem>>, vector<96x128xbf16>
    %c0_5 = arith.constant 0 : index
    %c0_6 = arith.constant 0 : index
    %4 = vector.load %arg3[%c0_5, %c0_6] : memref<1x128xf32, #tpu.memory_space<vmem>>, vector<1x128xf32>
    %5 = vector.extract_strided_slice %3 {offsets = [0, 0], sizes = [50, 20], strides = [1, 1]} : vector<96x128xbf16> to vector<50x20xbf16>
    %6 = vector.extract_strided_slice %3 {offsets = [64, 0], sizes = [20, 2], strides = [1, 1]} : vector<96x128xbf16> to vector<20x2xbf16>
    %7 = vector.extract_strided_slice %4 {offsets = [0, 0], sizes = [1, 50], strides = [1, 1]} : vector<1x128xf32> to vector<1x50xf32>
    %8 = vector.extract_strided_slice %4 {offsets = [0, 50], sizes = [1, 20], strides = [1, 1]} : vector<1x128xf32> to vector<1x20xf32>
    %9 = vector.extract_strided_slice %4 {offsets = [0, 70], sizes = [1, 2], strides = [1, 1]} : vector<1x128xf32> to vector<1x2xf32>
    %cst = arith.constant dense<0.000000e+00> : vector<8x50xf32>
    %10 = tpu.matmul %1, %2, %cst {dimension_numbers = #tpu.dot_dimension_numbers<[1], [1], [0], [0], [0, 0, 1, 0], [], []>} : vector<8x2500xbf16>, vector<50x2500xbf16>, vector<8x50xf32> -> vector<8x50xf32>
    %11 = vector.broadcast %7 : vector<1x50xf32> to vector<8x50xf32>
    %12 = arith.addf %10, %11 : vector<8x50xf32>
    %13 = arith.truncf %12 : vector<8x50xf32> to vector<8x50xbf16>
    %cst_7 = arith.constant dense<0.000000e+00> : vector<8x20xf32>
    %14 = tpu.matmul %13, %5, %cst_7 {dimension_numbers = #tpu.dot_dimension_numbers<[1], [0], [0], [1], [0, 0, 1, 1], [], []>} : vector<8x50xbf16>, vector<50x20xbf16>, vector<8x20xf32> -> vector<8x20xf32>
    %15 = vector.broadcast %8 : vector<1x20xf32> to vector<8x20xf32>
    %16 = arith.addf %14, %15 : vector<8x20xf32>
    %17 = math.tanh %16 : vector<8x20xf32>
    %18 = arith.truncf %17 : vector<8x20xf32> to vector<8x20xbf16>
    %cst_8 = arith.constant dense<0.000000e+00> : vector<8x2xf32>
    %19 = tpu.matmul %18, %6, %cst_8 {dimension_numbers = #tpu.dot_dimension_numbers<[1], [0], [0], [1], [0, 0, 1, 1], [], []>} : vector<8x20xbf16>, vector<20x2xbf16>, vector<8x2xf32> -> vector<8x2xf32>
    %20 = vector.broadcast %9 : vector<1x2xf32> to vector<8x2xf32>
    %21 = arith.addf %19, %20 : vector<8x2xf32>
    %c0_9 = arith.constant 0 : index
    %c0_10 = arith.constant 0 : index
    %22 = vector.load %arg4[%c0_9, %c0_10] : memref<8x2xf32, #tpu.memory_space<vmem>>, vector<8x2xf32>
    tpu.vector_store %arg4[%c0_9, %c0_10], %21 {strides = array<i32>} : memref<8x2xf32, #tpu.memory_space<vmem>>, vector<8x2xf32>,
    return
  }
}

</mosaic_0001>

<bundles_post_ra>
// kernel: tpu_custom_call.1
= control target key start
LH: loop header
LB: loop body
LE: loop exit
PB: predicated region body
PF: predicated region fallthrough
CT: control target
= control target key end

     0   :  { %9 = vsyncpa [#allocation3], 0  ;;  %s1493_s0 = inlined_call_operand.hbm [shape: f32[8,2500], index: 0, kind: input, shape index: {}]   ;;  %s1494_s1 = inlined_call_operand.hbm [shape: bf16[50,2500], index: 1, kind: input, shape index: {}]   ;;  %s1495_s2 = inlined_call_operand.hbm [shape: bf16[96,128], index: 2, kind: input, shape index: {}]   ;;  %s1496_s3 = inlined_call_operand.vmem [shape: f32[1,128], index: 3, kind: input, shape index: {}]   ;;  %s1497_s4 = inlined_call_operand.vmem [shape: f32[8,2], index: 4, kind: output, shape index: {}]  }
   0x1   :  { %10 = vsyncpa [#allocation5], 0  ;;  %s1424_s15 = smov [#allocation4]  }
   0x2   :  { %s26_s16 = sshll.u32 %s1424_s15, 4  ;;  %s27_s16 = int_to_ptr.vmem [resolvable:$true] %s26_s16 }
   0x3   :  { %s1368_s17 = scalar_lea.vmem %s27_s16, 8960  ;;  %p1373_p1 = scmp.lt.s32.totalorder %s27_s16, %s27_s16 }
   0x4   :  { %p1369_p0 = scmp.ne.s32.totalorder %s27_s16, %s1368_s17  ;;  %p1374_p2 = scmp.lt.s32.totalorder %s1368_s17, %s1368_s17 }
   0x6   :  { %p1375_p3 = por %p1374_p2, %p1373_p1 }
   0x8   :  { %p1376_p4 = pnand %p1375_p3, %p1369_p0 }
   0xa   :  { %1379 = shalt.err (!%p1376_p4)
}
   0xb   :  { %s1425_s18 = smov 1280   ;;  %s1426_s19 = smov 80  }
   0xc   :  { %32 = dma.hbm_to_vmem [thread:$0]  %s1494_s1, 8960, %s27_s16, [#allocation5], %s1425_s18, %s1425_s18, %s1426_s19  }
   0xd   :  { %s1427_s22 = smov [#allocation2]   ;;  %s1428_s24 = smov [#allocation6]  }
   0xe   :  { %s17_s23 = sshll.u32 %s1427_s22, 4  ;;  %s38_s25 = sshll.u32 %s1428_s24, 4  ;;  %s18_s23 = int_to_ptr.vmem [resolvable:$true] %s17_s23  ;;  %s39_s25 = int_to_ptr.vmem [resolvable:$true] %s38_s25 }
   0xf   :  { %s1388_s26 = scalar_lea.vmem %s18_s23, 2560  ;;  %p1393_p6 = scmp.lt.s32.totalorder %s18_s23, %s18_s23 }
  0x10   :  { %p1389_p5 = scmp.ne.s32.totalorder %s18_s23, %s1388_s26  ;;  %p1394_p7 = scmp.lt.s32.totalorder %s1388_s26, %s1388_s26 }
  0x12   :  { %p1395_p8 = por %p1394_p7, %p1393_p6 }
  0x14   :  { %p1396_p9 = pnand %p1395_p8, %p1389_p5 }
  0x16   :  { %1399 = shalt.err (!%p1396_p9)
}
  0x17   :  { %20 = dma.hbm_to_vmem [thread:$0]  %s1493_s0, 2560, %s18_s23, [#allocation3]  }
  0x18   :  { %s1408_s29 = scalar_lea.vmem %s39_s25, 768  ;;  %p1413_p11 = scmp.lt.s32.totalorder %s39_s25, %s39_s25 }
  0x19   :  { %p1409_p10 = scmp.ne.s32.totalorder %s39_s25, %s1408_s29  ;;  %p1414_p12 = scmp.lt.s32.totalorder %s1408_s29, %s1408_s29 }
  0x1b   :  { %p1415_p13 = por %p1414_p12, %p1413_p11 }
  0x1d   :  { %p1416_p0 = pnand %p1415_p13, %p1409_p10 }
  0x1f   :  { %1419 = shalt.err (!%p1416_p0)
}
  0x20   :  { %s1429_s1 = smov 64   ;;  %s1430_s30 = smov 4  }
  0x21   :  { %44 = dma.hbm_to_vmem [thread:$0]  %s1495_s2, 768, %s39_s25, [#allocation5], %s1429_s1, %s1429_s1, %s1430_s30  }
  0x22   :  { %1420 = dma.done.wait [#allocation3], 2560  }
  0x23   :  { %1421 = vsyncadd [#allocation3], 4294964736 }
  0x24   :  { %1422 = dma.done.wait [#allocation5], 9728  }
  0x25   :  { %1423 = vsyncadd [#allocation5], 4294957568  ;;  %v157_v0 = vld [vmem:[#allocation4 + $0x1e0] sm:$0x11]  ;;  %v158_v1 = vld [vmem:[#allocation4 + $0x1e8] sm:$0x11] }
  0x26   :  { %v1171_v2 = vcombine.high %v157_v0, %v157_v0  ;;  %v1173_v3 = vcombine.high %v158_v1, %v158_v1  ;;  %v1170_v4 = vcombine.low %v157_v0, %v157_v0  ;;  %v1172_v5 = vcombine.low %v158_v1, %v158_v1  ;;  %v1246_v6 = vld [vmem:[#allocation4 + $0x144] ss:$80 sps:$4 sm:$0xff]   ;;  %v1248_v7 = vld [vmem:[#allocation4 + $0x14c] ss:$80 sps:$4 sm:$0xff]   ;;  %v1250_v8 = vld [vmem:[#allocation4 + $0x140] ss:$80 sps:$4 sm:$0xff]  }
  0x27   :  { %v1251_v9 = vld [vmem:[#allocation4 + $0x148] ss:$80 sps:$4 sm:$0xff]   ;;  %v1252_v11 = vld [vmem:[#allocation4 + $0xa4] ss:$80 sps:$4 sm:$0xff]   ;;  %v1254_v12 = vld [vmem:[#allocation4 + $0xac] ss:$80 sps:$4 sm:$0xff]  }
  0x28   :  { %574 = vmatprep.subr.bf16.mxu0 %v1171_v2  ;;  %614 = vmatprep.subr.bf16.mxu1 %v1173_v3  ;;  %v58_v10 = vld [vmem:[#allocation2 + $0x8] sm:$0xff]  ;;  %v60_v14 = vld [vmem:[#allocation2 + $0x18] sm:$0xff]  ;;  %v1256_v16 = vld [vmem:[#allocation4 + $0xa0] ss:$80 sps:$4 sm:$0xff]   ;;  %vm550_vm0 = vcmask 556032   ;;  %vm995_vm1 = vcmask 1040384  }
  0x29   :  { %575 = vmatpush1.bf16.xpose.msra.mxu0 %v1170_v4  ;;  %615 = vmatpush1.bf16.xpose.msra.mxu1 %v1172_v5  ;;  %v78_v13 = vpack.c.bf16 %v58_v10, %v58_v10  ;;  %v80_v15 = vpack.c.bf16 %v60_v14, %v60_v14  ;;  %v1257_v17 = vld [vmem:[#allocation4 + $0xa8] ss:$80 sps:$4 sm:$0xff]   ;;  %v1258_v18 = vld [vmem:[#allocation4 + $0x4] ss:$80 sps:$4 sm:$0xff]   ;;  %v1260_v19 = vld [vmem:[#allocation4 + $0xc] ss:$80 sps:$4 sm:$0xff]  }
  0x2a   :  { %576 = vmatprep.subr.bf16.mxu0 %v1246_v6  ;;  %616 = vmatprep.subr.bf16.mxu1 %v1248_v7  ;;  %v159_v20 = vld [vmem:[#allocation4 + $0x1f0] sm:$0x11]  ;;  %v160_v21 = vld [vmem:[#allocation4 + $0x1f8] sm:$0x11]  ;;  %v57_v26 = vld [vmem:[#allocation2] sm:$0xff]  ;;  %vm1432_vm2 = vmmov 0  }
  0x2b   :  { %598 = vmatprep.mubr.bf16.mxu0 %v78_v13  ;;  %638 = vmatprep.mubr.bf16.mxu1 %v80_v15  ;;  %v1262_v22 = vld [vmem:[#allocation4] ss:$80 sps:$4 sm:$0xff]   ;;  %v1263_v23 = vld [vmem:[#allocation4 + $0x8] ss:$80 sps:$4 sm:$0xff]   ;;  %v1175_v24 = vcombine.high %v159_v20, %v159_v20  ;;  %v1177_v25 = vcombine.high %v160_v21, %v160_v21  ;;  %v77_v28 = vpack.c.bf16 %v57_v26, %v57_v26  ;;  %v1270_v34 = vld [vmem:[#allocation4 + $0x154] ss:$80 sps:$4 sm:$0xff]  }
  0x2c   :  { %v59_v27 = vld [vmem:[#allocation2 + $0x10] sm:$0xff]  ;;  %v62_v30 = vld [vmem:[#allocation2 + $0x28] sm:$0xff]  ;;  %v64_v31 = vld [vmem:[#allocation2 + $0x38] sm:$0xff]  ;;  %v1174_v32 = vcombine.low %v159_v20, %v159_v20  ;;  %v1176_v33 = vcombine.low %v160_v21, %v160_v21  ;;  %vm991_vm3 = vcmask 408576   ;;  %vm1057_vm4 = vcmask 1041408   ;;  %s1434_s7 = smov 58  }
  0x2d   :  { %v79_v29 = vpack.c.bf16 %v59_v27, %v59_v27  ;;  %v1273_v35 = vld [vmem:[#allocation4 + $0x15c] ss:$80 sps:$4 sm:$0xff]   ;;  %v82_v36 = vpack.c.bf16 %v62_v30, %v62_v30  ;;  %v84_v37 = vpack.c.bf16 %v64_v31, %v64_v31  ;;  %v1268_v38 = vld [vmem:[#allocation4 + $0x150] ss:$80 sps:$4 sm:$0xff]   ;;  %v1271_v39 = vld [vmem:[#allocation4 + $0x158] ss:$80 sps:$4 sm:$0xff]  }
  0x2e   :  { %v1276_v40 = vld [vmem:[#allocation4 + $0xb4] ss:$80 sps:$4 sm:$0xff]   ;;  %v1279_v41 = vld [vmem:[#allocation4 + $0xbc] ss:$80 sps:$4 sm:$0xff]   ;;  %v1274_v42 = vld [vmem:[#allocation4 + $0xb0] ss:$80 sps:$4 sm:$0xff]  }
  0x2f   :  { %v1277_v43 = vld [vmem:[#allocation4 + $0xb8] ss:$80 sps:$4 sm:$0xff]   ;;  %v1282_v44 = vld [vmem:[#allocation4 + $0x14] ss:$80 sps:$4 sm:$0xff]   ;;  %v1285_v45 = vld [vmem:[#allocation4 + $0x1c] ss:$80 sps:$4 sm:$0xff]  }
  0x30   :  { %v161_v46 = vld [vmem:[#allocation4 + $0x200] sm:$0x11]  ;;  %v162_v47 = vld [vmem:[#allocation4 + $0x208] sm:$0x11]  ;;  %v63_v53 = vld [vmem:[#allocation2 + $0x30] sm:$0xff]  ;;  %vm1053_vm5 = vcmask 162816  }
  0x31   :  { %577 = vmatpush1.bf16.xpose.msra.mxu0 %v1250_v8  ;;  %617 = vmatpush1.bf16.xpose.msra.mxu1 %v1251_v9  ;;  %v1280_v48 = vld [vmem:[#allocation4 + $0x10] ss:$80 sps:$4 sm:$0xff]   ;;  %v1283_v49 = vld [vmem:[#allocation4 + $0x18] ss:$80 sps:$4 sm:$0xff]   ;;  %v1179_v50 = vcombine.high %v161_v46, %v161_v46  ;;  %v1181_v51 = vcombine.high %v162_v47, %v162_v47  ;;  %v83_v55 = vpack.c.bf16 %v63_v53, %v63_v53  ;;  %v1292_v60 = vld [vmem:[#allocation4 + $0x164] ss:$80 sps:$4 sm:$0xff]  }
  0x32   :  { %578 = vmatprep.subr.bf16.mxu0 %v1252_v11  ;;  %618 = vmatprep.subr.bf16.mxu1 %v1254_v12  ;;  %v61_v52 = vld [vmem:[#allocation2 + $0x20] sm:$0xff]  ;;  %v66_v56 = vld [vmem:[#allocation2 + $0x48] sm:$0xff]  ;;  %v68_v57 = vld [vmem:[#allocation2 + $0x58] sm:$0xff]  ;;  %v1178_v58 = vcombine.low %v161_v46, %v161_v46  ;;  %v1180_v59 = vcombine.low %v162_v47, %v162_v47  ;;  %vm1101_vm6 = vcmask 15360  }
  0x33   :  { %v81_v54 = vpack.c.bf16 %v61_v52, %v61_v52  ;;  %v1295_v61 = vld [vmem:[#allocation4 + $0x16c] ss:$80 sps:$4 sm:$0xff]   ;;  %v86_v62 = vpack.c.bf16 %v66_v56, %v66_v56  ;;  %v88_v63 = vpack.c.bf16 %v68_v57, %v68_v57  ;;  %v1290_v0 = vld [vmem:[#allocation4 + $0x160] ss:$80 sps:$4 sm:$0xff]   ;;  %v1293_v1 = vld [vmem:[#allocation4 + $0x168] ss:$80 sps:$4 sm:$0xff]  }
  0x34   :  { %v1298_v2 = vld [vmem:[#allocation4 + $0xc4] ss:$80 sps:$4 sm:$0xff]   ;;  %v1301_v3 = vld [vmem:[#allocation4 + $0xcc] ss:$80 sps:$4 sm:$0xff]   ;;  %v1296_v4 = vld [vmem:[#allocation4 + $0xc0] ss:$80 sps:$4 sm:$0xff]  }
  0x35   :  { %v1299_v5 = vld [vmem:[#allocation4 + $0xc8] ss:$80 sps:$4 sm:$0xff]   ;;  %v1304_v6 = vld [vmem:[#allocation4 + $0x24] ss:$80 sps:$4 sm:$0xff]   ;;  %v1307_v7 = vld [vmem:[#allocation4 + $0x2c] ss:$80 sps:$4 sm:$0xff]  }
  0x36   :  { %v163_v8 = vld [vmem:[#allocation4 + $0x210] sm:$0x11]  ;;  %v164_v9 = vld [vmem:[#allocation4 + $0x218] sm:$0x11]  ;;  %v65_v14 = vld [vmem:[#allocation2 + $0x40] sm:$0xff] }
  0x37   :  { %v1302_v10 = vld [vmem:[#allocation4 + $0x20] ss:$80 sps:$4 sm:$0xff]   ;;  %v1305_v11 = vld [vmem:[#allocation4 + $0x28] ss:$80 sps:$4 sm:$0xff]   ;;  %v1183_v12 = vcombine.high %v163_v8, %v163_v8  ;;  %v1185_v13 = vcombine.high %v164_v9, %v164_v9  ;;  %v1182_v20 = vcombine.low %v163_v8, %v163_v8  ;;  %v1184_v21 = vcombine.low %v164_v9, %v164_v9 }
  0x38   :  { %v67_v15 = vld [vmem:[#allocation2 + $0x50] sm:$0xff]  ;;  %v1315_v27 = vld [vmem:[#allocation4 + $0x178] ss:$80 sps:$4 sm:$0xff]  }
  0x39   :  { %579 = vmatpush1.bf16.xpose.msra.mxu0 %v1256_v16  ;;  %619 = vmatpush1.bf16.xpose.msra.mxu1 %v1257_v17  ;;  %v85_v16 = vpack.c.bf16 %v65_v14, %v65_v14  ;;  %v87_v17 = vpack.c.bf16 %v67_v15, %v67_v15  ;;  %v1312_v26 = vld [vmem:[#allocation4 + $0x170] ss:$80 sps:$4 sm:$0xff]   ;;  %v1321_v31 = vld [vmem:[#allocation4 + $0xd8] ss:$80 sps:$4 sm:$0xff]  }
  0x3a   :  { %580 = vmatprep.subr.bf16.mxu0 %v1258_v18  ;;  %620 = vmatprep.subr.bf16.mxu1 %v1260_v19  ;;  %v70_v18 = vld [vmem:[#allocation2 + $0x68] sm:$0xff]  ;;  %v72_v19 = vld [vmem:[#allocation2 + $0x78] sm:$0xff]  ;;  %v1318_v30 = vld [vmem:[#allocation4 + $0xd0] ss:$80 sps:$4 sm:$0xff]  }
  0x3b   :  { %v1334_v52 = vld [vmem:[#allocation4 + $0x180] ss:$80 sps:$4 sm:$0xff]   ;;  %v1339_v53 = vld [vmem:[#allocation4 + $0x188] ss:$80 sps:$4 sm:$0xff]  }
  0x3c   :  { %v1340_v56 = vld [vmem:[#allocation4 + $0xe0] ss:$80 sps:$4 sm:$0xff]   ;;  %v1345_v57 = vld [vmem:[#allocation4 + $0xe8] ss:$80 sps:$4 sm:$0xff]  }
  0x41   :  { %581 = vmatpush1.bf16.xpose.msra.mxu0 %v1262_v22  ;;  %621 = vmatpush1.bf16.xpose.msra.mxu1 %v1263_v23  ;;  %v1314_v22 = vld [vmem:[#allocation4 + $0x174] ss:$80 sps:$4 sm:$0xff]   ;;  %v1317_v23 = vld [vmem:[#allocation4 + $0x17c] ss:$80 sps:$4 sm:$0xff]  }
  0x42   :  { %654 = vmatprep.subr.bf16.mxu0 %v1175_v24  ;;  %694 = vmatprep.subr.bf16.mxu1 %v1177_v25  ;;  %v90_v24 = vpack.c.bf16 %v70_v18, %v70_v18  ;;  %v92_v25 = vpack.c.bf16 %v72_v19, %v72_v19 }
  0x48   :  { %599 = vmatmul.mubr.bf16.vlgmr.msra.gmra.mxu0 %v77_v28  ;;  %639 = vmatmul.mubr.bf16.vlgmr.msra.gmra.mxu1 %v79_v29  ;;  %v1320_v28 = vld [vmem:[#allocation4 + $0xd4] ss:$80 sps:$4 sm:$0xff]   ;;  %v1323_v29 = vld [vmem:[#allocation4 + $0xdc] ss:$80 sps:$4 sm:$0xff]  }
  0x49   :  { %655 = vmatpush1.bf16.xpose.msra.mxu0 %v1174_v32  ;;  %695 = vmatpush1.bf16.xpose.msra.mxu1 %v1176_v33  ;;  %v1326_v32 = vld [vmem:[#allocation4 + $0x34] ss:$80 sps:$4 sm:$0xff]   ;;  %v1329_v33 = vld [vmem:[#allocation4 + $0x3c] ss:$80 sps:$4 sm:$0xff]  }
  0x4a   :  { %656 = vmatprep.subr.bf16.mxu0 %v1270_v34  ;;  %696 = vmatprep.subr.bf16.mxu1 %v1273_v35  ;;  %v165_v34 = vld [vmem:[#allocation4 + $0x220] sm:$0x11]  ;;  %v166_v35 = vld [vmem:[#allocation4 + $0x228] sm:$0x11] }
  0x4b   :  { %678 = vmatprep.mubr.bf16.mxu0 %v82_v36  ;;  %718 = vmatprep.mubr.bf16.mxu1 %v84_v37  ;;  %v1324_v36 = vld [vmem:[#allocation4 + $0x30] ss:$80 sps:$4 sm:$0xff]   ;;  %v1327_v37 = vld [vmem:[#allocation4 + $0x38] ss:$80 sps:$4 sm:$0xff]   ;;  %v1186_v46 = vcombine.low %v165_v34, %v165_v34  ;;  %v1188_v47 = vcombine.low %v166_v35, %v166_v35 }
  0x51   :  { %657 = vmatpush1.bf16.xpose.msra.mxu0 %v1268_v38  ;;  %697 = vmatpush1.bf16.xpose.msra.mxu1 %v1271_v39  ;;  %v1187_v38 = vcombine.high %v165_v34, %v165_v34  ;;  %v1189_v39 = vcombine.high %v166_v35, %v166_v35 }
  0x52   :  { %658 = vmatprep.subr.bf16.mxu0 %v1276_v40  ;;  %698 = vmatprep.subr.bf16.mxu1 %v1279_v41  ;;  %v69_v40 = vld [vmem:[#allocation2 + $0x60] sm:$0xff]  ;;  %v71_v41 = vld [vmem:[#allocation2 + $0x70] sm:$0xff] }
  0x59   :  { %659 = vmatpush1.bf16.xpose.msra.mxu0 %v1274_v42  ;;  %699 = vmatpush1.bf16.xpose.msra.mxu1 %v1277_v43  ;;  %v89_v42 = vpack.c.bf16 %v69_v40, %v69_v40  ;;  %v91_v43 = vpack.c.bf16 %v71_v41, %v71_v41 }
  0x5a   :  { %660 = vmatprep.subr.bf16.mxu0 %v1282_v44  ;;  %700 = vmatprep.subr.bf16.mxu1 %v1285_v45  ;;  %v74_v44 = vld [vmem:[#allocation2 + $0x88] sm:$0xff]  ;;  %v76_v45 = vld [vmem:[#allocation2 + $0x98] sm:$0xff] }
  0x61   :  { %661 = vmatpush1.bf16.xpose.msra.mxu0 %v1280_v48  ;;  %701 = vmatpush1.bf16.xpose.msra.mxu1 %v1283_v49  ;;  %v1336_v48 = vld [vmem:[#allocation4 + $0x184] ss:$80 sps:$4 sm:$0xff]   ;;  %v1337_v49 = vld [vmem:[#allocation4 + $0x18c] ss:$80 sps:$4 sm:$0xff]  }
  0x62   :  { %734 = vmatprep.subr.bf16.mxu0 %v1179_v50  ;;  %774 = vmatprep.subr.bf16.mxu1 %v1181_v51  ;;  %v94_v50 = vpack.c.bf16 %v74_v44, %v74_v44  ;;  %v96_v51 = vpack.c.bf16 %v76_v45, %v76_v45 }
  0x68   :  { %679 = vmatmul.mubr.bf16.vlgmr.msra.gmra.mxu0 %v81_v54  ;;  %719 = vmatmul.mubr.bf16.vlgmr.msra.gmra.mxu1 %v83_v55  ;;  %v1342_v54 = vld [vmem:[#allocation4 + $0xe4] ss:$80 sps:$4 sm:$0xff]   ;;  %v1343_v55 = vld [vmem:[#allocation4 + $0xec] ss:$80 sps:$4 sm:$0xff]  }
  0x69   :  { %735 = vmatpush1.bf16.xpose.msra.mxu0 %v1178_v58  ;;  %775 = vmatpush1.bf16.xpose.msra.mxu1 %v1180_v59  ;;  %v1348_v58 = vld [vmem:[#allocation4 + $0x44] ss:$80 sps:$4 sm:$0xff]   ;;  %v1349_v59 = vld [vmem:[#allocation4 + $0x4c] ss:$80 sps:$4 sm:$0xff]  }
  0x6a   :  { %736 = vmatprep.subr.bf16.mxu0 %v1292_v60  ;;  %776 = vmatprep.subr.bf16.mxu1 %v1295_v61  ;;  %v1346_v60 = vld [vmem:[#allocation4 + $0x40] ss:$80 sps:$4 sm:$0xff]   ;;  %v1351_v61 = vld [vmem:[#allocation4 + $0x48] ss:$80 sps:$4 sm:$0xff]  }
  0x6b   :  { %758 = vmatprep.mubr.bf16.mxu0 %v86_v62  ;;  %798 = vmatprep.mubr.bf16.mxu1 %v88_v63  ;;  %v73_v62 = vld [vmem:[#allocation2 + $0x80] sm:$0xff]  ;;  %v75_v63 = vld [vmem:[#allocation2 + $0x90] sm:$0xff] }
  0x71   :  { %737 = vmatpush1.bf16.xpose.msra.mxu0 %v1290_v0  ;;  %777 = vmatpush1.bf16.xpose.msra.mxu1 %v1293_v1  ;;  %v93_v0 = vpack.c.bf16 %v73_v62, %v73_v62  ;;  %v95_v1 = vpack.c.bf16 %v75_v63, %v75_v63  ;;  %v1357_v62 = vld [vmem:[#allocation6 + $0x20] sm:$0xff]  }
  0x72   :  { %738 = vmatprep.subr.bf16.mxu0 %v1298_v2  ;;  %778 = vmatprep.subr.bf16.mxu1 %v1301_v3  ;;  %v1352_v2 = vld [vmem:[#allocation6 + $0x18] ss:$0 sps:$4 sm:$0xff]   ;;  %v1431_v3 = vmov 0.0  }
  0x79   :  { %739 = vmatpush1.bf16.xpose.msra.mxu0 %v1296_v4  ;;  %779 = vmatpush1.bf16.xpose.msra.mxu1 %v1299_v5  ;;  %v997_v4 = vsel %vm995_vm1, %v1352_v2, 0  ;;  %v1353_v5 = vld [vmem:[#allocation6 + $0x10] sm:$0xff]  }
  0x7a   :  { %740 = vmatprep.subr.bf16.mxu0 %v1304_v6  ;;  %780 = vmatprep.subr.bf16.mxu1 %v1307_v7  ;;  %v1481_v6 = vld [vmem:[%s1496_s3] ss:$0 sm:$0xff]  ;;  %v1354_v7 = vld [vmem:[#allocation6 + $0x8] sm:$0xff]   ;;  %s1433_s3 = smov 78  }
  0x7b   :  { %988 = vrot.lane.b32.xlu0 %v1481_v6, %s1433_s3 }
  0x7f   :  { %1050 = vrot.lane.b32.xlu0 %v1481_v6, %s1434_s7 }
  0x81   :  { %741 = vmatpush1.bf16.xpose.msra.mxu0 %v1302_v10  ;;  %781 = vmatpush1.bf16.xpose.msra.mxu1 %v1305_v11 }
  0x82   :  { %814 = vmatprep.subr.bf16.mxu0 %v1183_v12  ;;  %854 = vmatprep.subr.bf16.mxu1 %v1185_v13  ;;  %v1355_v13 = vld [vmem:[#allocation6] sm:$0xff]  }
  0x88   :  { %759 = vmatmul.mubr.bf16.vlgmr.msra.gmra.mxu0 %v85_v16  ;;  %799 = vmatmul.mubr.bf16.vlgmr.msra.gmra.mxu1 %v87_v17 }
  0x89   :  { %815 = vmatpush1.bf16.xpose.msra.mxu0 %v1182_v20  ;;  %855 = vmatpush1.bf16.xpose.msra.mxu1 %v1184_v21 }
  0x8a   :  { %816 = vmatprep.subr.bf16.mxu0 %v1314_v22  ;;  %856 = vmatprep.subr.bf16.mxu1 %v1317_v23 }
  0x8b   :  { %838 = vmatprep.mubr.bf16.mxu0 %v90_v24  ;;  %878 = vmatprep.mubr.bf16.mxu1 %v92_v25 }
  0x91   :  { %817 = vmatpush1.bf16.xpose.msra.mxu0 %v1312_v26  ;;  %857 = vmatpush1.bf16.xpose.msra.mxu1 %v1315_v27 }
  0x92   :  { %818 = vmatprep.subr.bf16.mxu0 %v1320_v28  ;;  %858 = vmatprep.subr.bf16.mxu1 %v1323_v29 }
  0x99   :  { %819 = vmatpush1.bf16.xpose.msra.mxu0 %v1318_v30  ;;  %859 = vmatpush1.bf16.xpose.msra.mxu1 %v1321_v31 }
  0x9a   :  { %820 = vmatprep.subr.bf16.mxu0 %v1326_v32  ;;  %860 = vmatprep.subr.bf16.mxu1 %v1329_v33 }
  0xa1   :  { %821 = vmatpush1.bf16.xpose.msra.mxu0 %v1324_v36  ;;  %861 = vmatpush1.bf16.xpose.msra.mxu1 %v1327_v37 }
  0xa2   :  { %894 = vmatprep.subr.bf16.mxu0 %v1187_v38  ;;  %1190 = vmatprep.subr.msk.bf16.mxu1 %vm550_vm0, %v1189_v39 }
  0xa8   :  { %839 = vmatmul.mubr.bf16.vlgmr.msra.gmra.mxu0 %v89_v42  ;;  %879 = vmatmul.mubr.bf16.vlgmr.msra.gmra.mxu1 %v91_v43 }
  0xa9   :  { %895 = vmatpush1.bf16.xpose.msra.mxu0 %v1186_v46  ;;  %935 = vmatpush1.bf16.xpose.msra.mxu1 %v1188_v47 }
  0xaa   :  { %896 = vmatprep.subr.bf16.mxu0 %v1336_v48  ;;  %1191 = vmatprep.subr.msk.bf16.mxu1 %vm550_vm0, %v1337_v49 }
  0xab   :  { %918 = vmatprep.mubr.bf16.mxu0 %v94_v50  ;;  %1194 = vmatprep.mubr.msk.bf16.mxu1 %vm550_vm0, %v96_v51 }
  0xb1   :  { %897 = vmatpush1.bf16.xpose.msra.mxu0 %v1334_v52  ;;  %937 = vmatpush1.bf16.xpose.msra.mxu1 %v1339_v53 }
  0xb2   :  { %898 = vmatprep.subr.bf16.mxu0 %v1342_v54  ;;  %1192 = vmatprep.subr.msk.bf16.mxu1 %vm550_vm0, %v1343_v55 }
  0xb9   :  { %899 = vmatpush1.bf16.xpose.msra.mxu0 %v1340_v56  ;;  %939 = vmatpush1.bf16.xpose.msra.mxu1 %v1345_v57 }
  0xba   :  { %900 = vmatprep.subr.bf16.mxu0 %v1348_v58  ;;  %1193 = vmatprep.subr.msk.bf16.mxu1 %vm550_vm0, %v1349_v59 }
  0xc1   :  { %901 = vmatpush1.bf16.xpose.msra.mxu0 %v1346_v60  ;;  %941 = vmatpush1.bf16.xpose.msra.mxu1 %v1351_v61  ;;  %v1356_v60 = vld [vmem:[#allocation6 + $0x28] ss:$0 sps:$4 sm:$0xff]  }
  0xc2   :  { %1211 = vmatprep.subr.bf16.mxu0 %v1431_v3  ;;  %1223 = vmatprep.subr.bf16.mxu1 %v1431_v3  ;;  %v1059_v61 = vsel %vm1057_vm4, %v1356_v60, 0 }
  0xc8   :  { %919 = vmatmul.mubr.bf16.vlgmr.msra.gmra.mxu0 %v93_v0  ;;  %959 = vmatmul.mubr.bf16.vlgmr.msra.gmra.mxu1 %v95_v1 }
  0xc9   :  { %1212 = vmatpush3.bf16.msra.mxu0 %v997_v4  ;;  %1219 = vmatprep.mubr.msk.bf16.mxu0 %vm1432_vm2, %v1431_v3 }
  0xca   :  { %1213 = vmatprep.subr.bf16.mxu0 %v1431_v3  ;;  %1227 = vmatprep.mubr.msk.bf16.mxu1 %vm1432_vm2, %v1431_v3 }
  0xcb   :  { %1224 = vmatpush3.bf16.msra.mxu1 %v1059_v61 }
  0xcc   :  { %1225 = vmatprep.subr.bf16.mxu1 %v1431_v3 }
  0xcd   :  { %1214 = vmatpush3.bf16.msra.mxu0 %v1353_v5 }
  0xce   :  { %1215 = vmatprep.subr.bf16.mxu0 %v1431_v3 }
  0xcf   :  { %1226 = vmatpush3.bf16.msra.mxu1 %v1357_v62 }
  0xd1   :  { %1216 = vmatpush3.bf16.msra.mxu0 %v1354_v7 }
  0xd2   :  { %1217 = vmatprep.subr.bf16.mxu0 %v1431_v3 }
  0xd5   :  { %1218 = vmatpush3.bf16.msra.mxu0 %v1355_v13 }
  0xed   :  { %v989_v63 = vpop.permute.xlu0 %988 }
 0x108   :  { %v600_v8 = vpop.f32.mrf.mxu0  ;;  %v640_v9 = vpop.f32.mrf.mxu1 }
 0x109   :  { %v601_v10 = vadd.f32 %v1481_v6, %v600_v8 }
 0x10a   :  { %v602_v11 = vpop.f32.mrf.mxu0  ;;  %v642_v12 = vpop.f32.mrf.mxu1 }
 0x10b   :  { %v641_v14 = vadd.f32 %v640_v9, %v601_v10  ;;  %v1051_v9 = vpop.permute.xlu0 %1050 }
 0x10c   :  { %v603_v15 = vpop.f32.mrf.mxu0  ;;  %v643_v16 = vpop.f32.mrf.mxu1 }
 0x10e   :  { %v604_v17 = vpop.f32.mrf.mxu0  ;;  %v644_v18 = vpop.f32.mrf.mxu1 }
 0x128   :  { %v680_v19 = vpop.f32.mrf.mxu0  ;;  %v720_v20 = vpop.f32.mrf.mxu1 }
 0x129   :  { %v681_v21 = vadd.f32 %v680_v19, %v641_v14 }
 0x12a   :  { %v682_v22 = vpop.f32.mrf.mxu0  ;;  %v722_v23 = vpop.f32.mrf.mxu1 }
 0x12b   :  { %v721_v24 = vadd.f32 %v720_v20, %v681_v21 }
 0x12c   :  { %v683_v25 = vpop.f32.mrf.mxu0  ;;  %v723_v26 = vpop.f32.mrf.mxu1 }
 0x12e   :  { %v684_v27 = vpop.f32.mrf.mxu0  ;;  %v724_v28 = vpop.f32.mrf.mxu1 }
 0x148   :  { %v760_v29 = vpop.f32.mrf.mxu0  ;;  %v800_v30 = vpop.f32.mrf.mxu1 }
 0x149   :  { %v761_v45 = vadd.f32 %v760_v29, %v721_v24 }
 0x14a   :  { %v762_v31 = vpop.f32.mrf.mxu0  ;;  %v802_v32 = vpop.f32.mrf.mxu1 }
 0x14b   :  { %v801_v46 = vadd.f32 %v800_v30, %v761_v45 }
 0x14c   :  { %v763_v33 = vpop.f32.mrf.mxu0  ;;  %v803_v34 = vpop.f32.mrf.mxu1 }
 0x14e   :  { %v764_v35 = vpop.f32.mrf.mxu0  ;;  %v804_v36 = vpop.f32.mrf.mxu1 }
 0x168   :  { %v840_v37 = vpop.f32.mrf.mxu0  ;;  %v880_v38 = vpop.f32.mrf.mxu1 }
 0x169   :  { %v841_v47 = vadd.f32 %v840_v37, %v801_v46 }
 0x16a   :  { %v842_v39 = vpop.f32.mrf.mxu0  ;;  %v882_v40 = vpop.f32.mrf.mxu1 }
 0x16b   :  { %v881_v48 = vadd.f32 %v880_v38, %v841_v47 }
 0x16c   :  { %v843_v41 = vpop.f32.mrf.mxu0  ;;  %v883_v42 = vpop.f32.mrf.mxu1 }
 0x16e   :  { %v844_v43 = vpop.f32.mrf.mxu0  ;;  %v884_v44 = vpop.f32.mrf.mxu1 }
 0x188   :  { %v920_v49 = vpop.f32.mrf.mxu0  ;;  %v960_v50 = vpop.f32.mrf.mxu1 }
 0x189   :  { %v921_v51 = vadd.f32 %v920_v49, %v881_v48 }
 0x18a   :  { %v922_v52 = vpop.f32.mrf.mxu0  ;;  %v962_v53 = vpop.f32.mrf.mxu1 }
 0x18b   :  { %v961_v54 = vadd.f32 %v960_v50, %v921_v51 }
 0x18c   :  { %v923_v55 = vpop.f32.mrf.mxu0  ;;  %v963_v56 = vpop.f32.mrf.mxu1 }
 0x18d   :  { %v966_v57 = vpack.c.bf16 %v961_v54, %v961_v54 }
 0x18e   :  { %v924_v58 = vpop.f32.mrf.mxu0  ;;  %v964_v59 = vpop.f32.mrf.mxu1 }
 0x18f   :  { %1220 = vmatmul.mubr.msk.bf16.vlgmr.msra.gmra.mxu0 %vm991_vm3, %v966_v57 }
 0x24f   :  { %v1033_v0 = vpop.f32.mrf.mxu0 }
 0x250   :  { %v1034_v1 = vadd.f32 %v1033_v0, %v989_v63 }
 0x251   :  { %v1221_v2 = vpop.f32.mrf.mxu0 }
 0x252   :  { %1358 = vtanh.f32 %v1034_v1 }
 0x253   :  { %v1036_v4 = vpop.f32.mrf.mxu0 }
 0x255   :  { %v1222_v5 = vpop.f32.mrf.mxu0 }
 0x25f   :  { %v1359_v7 = vpop.eup %1358 }
 0x260   :  { %v1040_v8 = vpack.c.bf16 %v1359_v7, %v1359_v7 }
 0x262   :  { %1228 = vmatmul.mubr.msk.bf16.vlgmr.msra.gmra.mxu1 %vm1053_vm5, %v1040_v8 }
 0x322   :  { %v1095_v10 = vpop.f32.mrf.mxu1 }
 0x323   :  { %v1096_v3 = vadd.f32 %v1095_v10, %v1051_v9 }
 0x324   :  { %v1229_v11 = vpop.f32.mrf.mxu1 }
 0x325   :  { %1102 = vst.msk [vmem:[%s1497_s4] sm:$0xff] %vm1101_vm6, %v1096_v3 }
 0x326   :  { %v1098_v6 = vpop.f32.mrf.mxu1 }
 0x328   :  { %v1230_v12 = vpop.f32.mrf.mxu1 }
 0x329   :  { %1107 = vsyncpa [#allocation3], 1 }
 0x32a   :  { %1108 = vsyncpa [#allocation5], 1 }

</bundles_post_ra>
